<compile_context>
chip_gen: v7x
topology: tpu7x:2x2x1
jax: 0.10.0
libtpu: 0.0.40
codegen_flags: <defaults>
</compile_context>

<pallas_src>
import functools

import jax
import jax.numpy as jnp
import numpy as np
from jax import lax
from jax.experimental import pallas as pl
from jax.experimental.pallas import tpu as pltpu

LANE = 128


def _round_up(v, m):
    return ((v + m - 1) // m) * m


# ----------------------------- Pallas kernel ---------------------------------

def _qconv1d_kernel(params_ref, x_ref, w_ref, alpha_ref, beta_ref, b_ref, o_ref,
                    *scratch, K, TL, TL_in, use_codes, quantize_act, windowed):
    # params_ref: SMEM (3,) f32: [clip, scale, inv_scale]
    # x_ref:      non-windowed: VMEM (1, Cin, TL_in) block (full row per batch)
    #             windowed    : HBM ref (N, Cin, L_pad) (memory_space=pl.ANY)
    # w_ref:      VMEM (Cout, K*Cin)  (bf16 weight codes or f32 dequant weights,
    #                                  column j = k*Cin + c)
    # alpha/beta/b_ref: VMEM (Cout, 1) f32 per-channel epilogue constants
    # o_ref:      VMEM (1, Cout, TL)
    # scratch (windowed only): xbuf VMEM (2, Cin, TL_in) f32, sem DMA((2,))
    t = pl.program_id(1)

    if windowed:
        xbuf, sem = scratch
        n = pl.program_id(0)

        def issue(tile_idx, slot_idx):
            pltpu.make_async_copy(
                x_ref.at[n, :, pl.ds(tile_idx * TL, TL_in)],
                xbuf.at[slot_idx], sem.at[slot_idx]).start()

        @pl.when(t == 0)
        def _():
            issue(0, 0)                       # first tile of this batch row

        slot = t % 2
        # wait for tile t (issued just above, or prefetched at step t-1)
        pltpu.make_async_copy(x_ref.at[n, :, pl.ds(0, TL_in)],
                              xbuf.at[slot], sem.at[slot]).wait()

        @pl.when(t + 1 < pl.num_programs(1))
        def _():
            issue(t + 1, 1 - slot)            # prefetch next halo window

        x = xbuf[slot]                        # (Cin, TL_in) f32
    else:
        x = x_ref[0]                          # (Cin, TL_in) f32

    clip = params_ref[0]
    scale = params_ref[1]
    inv_scale = params_ref[2]

    if use_codes:
        # Activation codes: integers in [0, 2^abits - 1]  ->  exact in bf16.
        codes = jnp.floor(scale * jnp.clip(x, 0.0, clip))          # f32 ints
        cb = codes.astype(jnp.bfloat16)
        # In-kernel im2col: row k*Cin + c of `col` is codes[c, j + k], matching
        # the column order of w_ref.
        # TODO(synk): for Cin % 8 != 0 or very large K*Cin the concat relayout
        #             / col buffer could be replaced by K accumulating dots.
        col = jnp.concatenate([cb[:, k:k + TL] for k in range(K)], axis=0)
        acc = jnp.dot(w_ref[...], col, preferred_element_type=jnp.float32)
        # Zero-point correction: colsum[j] = sum_{c,k} code_x[c, j + k]
        s1 = jnp.sum(codes, axis=0, keepdims=True)                 # (1, TL_in)
        colsum = s1[:, 0:TL]
        for k in range(1, K):
            colsum = colsum + s1[:, k:k + TL]
        out = alpha_ref[...] * acc + beta_ref[...] * colsum + b_ref[...]
    else:
        if quantize_act:
            x = jnp.floor(scale * jnp.clip(x, 0.0, clip)) * inv_scale
        col = jnp.concatenate([x[:, k:k + TL] for k in range(K)], axis=0)
        out = jnp.dot(w_ref[...], col,
                      preferred_element_type=jnp.float32) + b_ref[...]

    o_ref[0] = out.astype(o_ref.dtype)


# ------------------------------- wrappers -------------------------------------

def prepare_quantized_weight(weight, wbits=8, use_codes=True):
    """Per-output-channel asymmetric min/max weight quant in im2col layout.

    Returns (w_mat, S_w, zp):
      use_codes=True : w_mat (Cout, K*Cin) bf16 zero-pointed integer codes
                       (column j = k*Cin + c), with wq = (code + zp) * S_w.
      use_codes=False: w_mat (Cout, K*Cin) f32 dequantized weights, zp = 0.

    For inference with static weights call this once and pass the result via
    `prepared=` instead of re-quantizing on every forward.
    """
    Cout, Cin, K = weight.shape
    weight = weight.astype(jnp.float32)
    if wbits == 0:
        # The PyTorch module zeroes the weights entirely for wbits == 0.
        return (jnp.zeros((Cout, K * Cin), jnp.float32),
                jnp.ones((Cout,), jnp.float32), jnp.zeros((Cout,), jnp.float32))

    wf = weight.reshape(Cout, -1)
    ch_max = wf.max(axis=1)
    ch_min = wf.min(axis=1)
    ch_range = ch_max - ch_min
    ch_range = jnp.where(ch_range == 0, jnp.float32(1.0), ch_range)
    S_w = ch_range / jnp.float32(2 ** wbits - 1)                    # (Cout,)
    q = jnp.round(weight / S_w[:, None, None])                      # int-valued f32

    if use_codes:
        # Midpoint zero point keeps codes within ~[-129, 129] (exact in bf16)
        # and keeps dot + correction the same magnitude as the result.
        zp = jnp.round(0.5 * (ch_min + ch_max) / S_w)               # int-valued
        codes = q - zp[:, None, None]
        w_mat = jnp.transpose(codes, (0, 2, 1)).reshape(Cout, K * Cin)
        return w_mat.astype(jnp.bfloat16), S_w, zp

    wq = q * S_w[:, None, None]
    w_mat = jnp.transpose(wq, (0, 2, 1)).reshape(Cout, K * Cin)
    return w_mat.astype(jnp.float32), S_w, jnp.zeros_like(S_w)


def quantized_chan_conv1d(x, weight, bias, clip_val, *, wbits=8, abits=8,
                          first_layer=False, prepared=None, max_l_tile=1024):
    """Forward of QuantizedChanConv1d.  x: (N, Cin, L) f32 -> (N, Cout, L-K+1)."""
    # TODO(synk): only the Conv1d defaults used by the module forward are
    #             implemented (stride=1, padding=0, dilation=1, groups=1).
    # TODO(synk): abits == 0 (degenerate / NaN in the PyTorch module) is not
    #             reproduced.
    N, Cin, L = x.shape
    Cout, Cin_w, K = weight.shape
    assert Cin_w == Cin
    L_out = L - K + 1
    assert L_out > 0
    assert max_l_tile % LANE == 0

    quantize_act = not first_layer
    use_codes = quantize_act and 0 < wbits <= 8 and 0 < abits <= 8
    if prepared is None:
        prepared = prepare_quantized_weight(weight, wbits=wbits, use_codes=use_codes)
    w_mat, S_w, zp = prepared
    KCin = K * Cin

    # ---- activation scale scalars (SMEM) & per-channel epilogue constants ----
    clip = jnp.asarray(clip_val, jnp.float32).reshape(-1)[0]
    n_steps = jnp.float32(2 ** abits - 1) if abits > 0 else jnp.float32(1.0)
    scale = n_steps / clip
    inv_scale = 1.0 / scale
    params = jnp.stack([clip, scale, inv_scale]).astype(jnp.float32)

    if use_codes:
        alpha = (S_w * inv_scale).reshape(Cout, 1).astype(jnp.float32)
        beta = (S_w * zp * inv_scale).reshape(Cout, 1).astype(jnp.float32)
    else:
        alpha = jnp.ones((Cout, 1), jnp.float32)
        beta = jnp.zeros((Cout, 1), jnp.float32)
    bias_col = bias.reshape(Cout, 1).astype(jnp.float32)

    # ---- L_out tiling ---------------------------------------------------------
    # max_l_tile: 1024 is a good default; 2048 is fine on v5e/v6e (128 MiB VMEM),
    # keep <=1024 on v7x (64 MiB/TC).
    if L_out <= max_l_tile:
        TL, T = L_out, 1
    else:
        TL = max_l_tile
        T = pl.cdiv(L_out, TL)
    # v7x has two TensorCores sharing the "parallel" grid axes; make sure the
    # grid has at least two steps when the problem allows it.
    if N * T < 2 and L_out >= 2 * LANE:
        TL = _round_up(pl.cdiv(L_out, 2), LANE)
        T = pl.cdiv(L_out, TL)

    windowed = T > 1
    TL_in = TL + K - 1
    L_out_p = T * TL
    L_pad = L_out_p + K - 1

    if L_pad > L:
        # Only triggered when L_out is not a multiple of the tile; one cheap pad
        # pass (the overlapping-window gather + transpose of the previous
        # version are gone).
        x_in = jnp.pad(x.astype(jnp.float32), ((0, 0), (0, 0), (0, L_pad - L)))
    else:
        x_in = x.astype(jnp.float32)

    if windowed:
        # x stays in HBM; halo windows are DMA'd manually (double-buffered).
        x_spec = pl.BlockSpec(memory_space=pl.ANY)
        scratch_shapes = [pltpu.VMEM((2, Cin, TL_in), jnp.float32),
                          pltpu.SemaphoreType.DMA((2,))]
        semantics = ("parallel", "arbitrary")   # t carries the prefetch slot
        x_vmem = 2 * Cin * max(TL_in, LANE) * 4
    else:
        # Single L tile: the full (Cin, L_pad) row is auto-pipelined per batch.
        x_spec = pl.BlockSpec((1, Cin, L_pad), lambda n, t: (n, 0, 0))
        scratch_shapes = []
        semantics = ("parallel", "parallel")
        x_vmem = 2 * Cin * max(L_pad, LANE) * 4

    # ---- VMEM budget (v7x: 64 MiB/TC) ----------------------------------------
    w_bytes = 2 if use_codes else 4
    est = (x_vmem
           + 2 * Cout * max(KCin, LANE) * w_bytes      # weights (double buffered)
           + 2 * 3 * Cout * LANE * 4                   # alpha / beta / bias
           + 2 * Cout * max(TL, LANE) * 4              # output tile
           + KCin * max(TL, LANE) * 4                  # im2col temp
           + 4 * Cin * max(TL_in, LANE) * 4)           # code / slice temps
    vmem_limit = int(min(max(2 * est + (4 << 20), 16 << 20), 64 << 20))

    flops = 2 * N * T * Cout * TL * KCin
    bytes_accessed = (4 * x_in.size + w_bytes * w_mat.size
                      + 4 * N * Cout * L_out_p + 16 * Cout)

    kernel = functools.partial(
        _qconv1d_kernel, K=K, TL=TL, TL_in=TL_in,
        use_codes=use_codes, quantize_act=quantize_act, windowed=windowed)

    out = pl.pallas_call(
        kernel,
        out_shape=jax.ShapeDtypeStruct((N, Cout, L_out_p), jnp.float32),
        grid_spec=pltpu.PrefetchScalarGridSpec(
            num_scalar_prefetch=0,
            grid=(N, T),
            in_specs=[
                pl.BlockSpec(memory_space=pltpu.SMEM),              # params
                x_spec,                                             # x
                pl.BlockSpec((Cout, KCin), lambda n, t: (0, 0)),    # weights
                pl.BlockSpec((Cout, 1), lambda n, t: (0, 0)),       # alpha
                pl.BlockSpec((Cout, 1), lambda n, t: (0, 0)),       # beta
                pl.BlockSpec((Cout, 1), lambda n, t: (0, 0)),       # bias
            ],
            out_specs=pl.BlockSpec((1, Cout, TL), lambda n, t: (n, 0, t)),
            scratch_shapes=scratch_shapes,
        ),
        compiler_params=pltpu.CompilerParams(
            dimension_semantics=semantics,
            vmem_limit_bytes=vmem_limit),
        cost_estimate=pl.CostEstimate(flops=flops, transcendentals=0,
                                      bytes_accessed=bytes_accessed),
    )(params, x_in, w_mat, alpha, beta, bias_col)

    return out if L_out_p == L_out else out[:, :, :L_out]


# ------------------------------- reference ------------------------------------

def _reference(x, weight, bias, clip_val, *, wbits=8, abits=8, first_layer=False):
    if not first_layer:
        clip = clip_val[0]
        scale = (2 ** abits - 1) / clip
        x = jnp.clip(x, 0.0, clip)
        x = jnp.floor(scale * x) / scale
    Cout = weight.shape[0]
    wf = weight.reshape(Cout, -1)
    ch_range = wf.max(1) - wf.min(1)
    ch_range = jnp.where(ch_range == 0, 1.0, ch_range)
    S_w = (ch_range / (2 ** wbits - 1)).reshape(Cout, 1, 1)
    wq = jnp.round(weight / S_w) * S_w
    out = lax.conv_general_dilated(
        x, wq, window_strides=(1,), padding="VALID",
        dimension_numbers=("NCH", "OIH", "NCH"))
    return out + bias.reshape(1, Cout, 1)


# --------------------------------- main ----------------------------------------

if __name__ == "__main__":
    key = jax.random.PRNGKey(0)

    def make_inputs(k, N, Cin, Cout, L, K):
        kx, kw, kb = jax.random.split(k, 3)
        x = jax.random.normal(kx, (N, Cin, L), dtype=jnp.float32) * 3.0
        bound = 1.0 / np.sqrt(Cin * K)
        w = jax.random.uniform(kw, (Cout, Cin, K), minval=-bound, maxval=bound,
                               dtype=jnp.float32)
        b = jax.random.uniform(kb, (Cout,), minval=-bound, maxval=bound,
                               dtype=jnp.float32)
        return x, w, b

    clip_val = jnp.array([6.0], dtype=jnp.float32)   # init_act_clip_val
    k1, k2 = jax.random.split(key)

    # Case 1: single L tile (auto-pipelined x block, no padding, exact layouts).
    x, w, b = make_inputs(k1, 2, 8, 8, 16, 3)
    out = jax.block_until_ready(quantized_chan_conv1d(x, w, b, clip_val))
    ref = jax.block_until_ready(_reference(x, w, b, clip_val))
    assert out.shape == (2, 8, 14)
    np.testing.assert_allclose(np.asarray(out), np.asarray(ref),
                               rtol=1e-5, atol=1e-5)

    # Case 2: multiple L tiles -> manual double-buffered halo DMA path, ragged
    # last tile, and cached (pre-quantized) weights.
    x, w, b = make_inputs(k2, 2, 8, 8, 300, 3)
    prepared = prepare_quantized_weight(w, wbits=8, use_codes=True)
    out = jax.block_until_ready(
        quantized_chan_conv1d(x, w, b, clip_val, prepared=prepared,
                              max_l_tile=128))
    ref = jax.block_until_ready(_reference(x, w, b, clip_val))
    assert out.shape == (2, 8, 298)
    np.testing.assert_allclose(np.asarray(out), np.asarray(ref),
                               rtol=1e-5, atol=1e-5)

    print("KERNEL_OK")
</pallas_src>

<mosaic_0001>
module attributes {stable_mosaic.version = 11 : i64} {
  func.func @_qconv1d_kernel(%arg0: i32, %arg1: i32, %arg2: memref<3xf32, #tpu.memory_space<smem>>, %arg3: memref<1x8x16xf32, #tpu.memory_space<vmem>>, %arg4: memref<8x24xbf16, #tpu.memory_space<vmem>>, %arg5: memref<8x1xf32, #tpu.memory_space<vmem>>, %arg6: memref<8x1xf32, #tpu.memory_space<vmem>>, %arg7: memref<8x1xf32, #tpu.memory_space<vmem>>, %arg8: memref<1x8x14xf32, #tpu.memory_space<vmem>>) attributes {dimension_semantics = [#tpu.dimension_semantics<parallel>, #tpu.dimension_semantics<parallel>], iteration_bounds = array<i64: 2, 1>, scalar_prefetch = 0 : i64, scratch_operands = 0 : i64, tpu.core_type = #tpu.core_type<tc>, window_params = [{transform_indices = @transform_0, window_bounds = array<i64: 3>}, {transform_indices = @transform_1, window_bounds = array<i64: 1, 8, 16>}, {pipeline_mode = #tpu.pipeline_mode<synchronous>, transform_indices = @transform_2, window_bounds = array<i64: 8, 24>}, {pipeline_mode = #tpu.pipeline_mode<synchronous>, transform_indices = @transform_3, window_bounds = array<i64: 8, 1>}, {pipeline_mode = #tpu.pipeline_mode<synchronous>, transform_indices = @transform_4, window_bounds = array<i64: 8, 1>}, {pipeline_mode = #tpu.pipeline_mode<synchronous>, transform_indices = @transform_5, window_bounds = array<i64: 8, 1>}, {transform_indices = @transform_6, window_bounds = array<i64: 1, 8, 14>}]} {
    %c0 = arith.constant 0 : index
    %c0_0 = arith.constant 0 : index
    %c0_1 = arith.constant 0 : index
    %0 = vector.load %arg3[%c0, %c0_0, %c0_1] : memref<1x8x16xf32, #tpu.memory_space<vmem>>, vector<1x8x16xf32>
    %1 = vector.shape_cast %0 : vector<1x8x16xf32> to vector<8x16xf32>
    %c0_2 = arith.constant 0 : index
    %2 = memref.load %arg2[%c0_2] : memref<3xf32, #tpu.memory_space<smem>>
    %c1 = arith.constant 1 : index
    %3 = memref.load %arg2[%c1] : memref<3xf32, #tpu.memory_space<smem>>
    %cst = arith.constant 0.000000e+00 : f32
    %4 = vector.broadcast %cst : f32 to vector<8x16xf32>
    %5 = arith.maximumf %4, %1 : vector<8x16xf32>
    %6 = vector.broadcast %2 : f32 to vector<8x16xf32>
    %7 = arith.minimumf %6, %5 : vector<8x16xf32>
    %8 = vector.broadcast %3 : f32 to vector<8x16xf32>
    %9 = arith.mulf %8, %7 : vector<8x16xf32>
    %10 = math.floor %9 : vector<8x16xf32>
    %11 = arith.truncf %10 : vector<8x16xf32> to vector<8x16xbf16>
    %12 = vector.extract_strided_slice %11 {offsets = [0, 0], sizes = [8, 14], strides = [1, 1]} : vector<8x16xbf16> to vector<8x14xbf16>
    %13 = vector.extract_strided_slice %11 {offsets = [0, 1], sizes = [8, 14], strides = [1, 1]} : vector<8x16xbf16> to vector<8x14xbf16>
    %14 = vector.extract_strided_slice %11 {offsets = [0, 2], sizes = [8, 14], strides = [1, 1]} : vector<8x16xbf16> to vector<8x14xbf16>
    %15 = tpu.concatenate %12, %13, %14 in 0 : vector<8x14xbf16>, vector<8x14xbf16>, vector<8x14xbf16> -> vector<24x14xbf16>
    %c0_3 = arith.constant 0 : index
    %c0_4 = arith.constant 0 : index
    %16 = vector.load %arg4[%c0_3, %c0_4] : memref<8x24xbf16, #tpu.memory_space<vmem>>, vector<8x24xbf16>
    %cst_5 = arith.constant dense<0.000000e+00> : vector<8x14xf32>
    %17 = tpu.matmul %16, %15, %cst_5 {dimension_numbers = #tpu.dot_dimension_numbers<[1], [0], [0], [1], [0, 0, 1, 1], [], []>} : vector<8x24xbf16>, vector<24x14xbf16>, vector<8x14xf32> -> vector<8x14xf32>
    %cst_6 = arith.constant dense<0.000000e+00> : vector<16xf32>
    %18 = vector.multi_reduction <add>, %10, %cst_6 [0] : vector<8x16xf32> to vector<16xf32>
    %19 = vector.shape_cast %18 : vector<16xf32> to vector<1x16xf32>
    %20 = vector.extract_strided_slice %19 {offsets = [0, 0], sizes = [1, 14], strides = [1, 1]} : vector<1x16xf32> to vector<1x14xf32>
    %21 = vector.extract_strided_slice %19 {offsets = [0, 1], sizes = [1, 14], strides = [1, 1]} : vector<1x16xf32> to vector<1x14xf32>
    %22 = arith.addf %20, %21 : vector<1x14xf32>
    %23 = vector.extract_strided_slice %19 {offsets = [0, 2], sizes = [1, 14], strides = [1, 1]} : vector<1x16xf32> to vector<1x14xf32>
    %24 = arith.addf %22, %23 : vector<1x14xf32>
    %c0_7 = arith.constant 0 : index
    %c0_8 = arith.constant 0 : index
    %25 = vector.load %arg5[%c0_7, %c0_8] : memref<8x1xf32, #tpu.memory_space<vmem>>, vector<8x1xf32>
    %26 = vector.broadcast %25 : vector<8x1xf32> to vector<8x14xf32>
    %27 = arith.mulf %26, %17 : vector<8x14xf32>
    %c0_9 = arith.constant 0 : index
    %c0_10 = arith.constant 0 : index
    %28 = vector.load %arg6[%c0_9, %c0_10] : memref<8x1xf32, #tpu.memory_space<vmem>>, vector<8x1xf32>
    %29 = vector.broadcast %28 : vector<8x1xf32> to vector<8x14xf32>
    %30 = vector.broadcast %24 : vector<1x14xf32> to vector<8x14xf32>
    %31 = arith.mulf %29, %30 : vector<8x14xf32>
    %32 = arith.addf %27, %31 : vector<8x14xf32>
    %c0_11 = arith.constant 0 : index
    %c0_12 = arith.constant 0 : index
    %33 = vector.load %arg7[%c0_11, %c0_12] : memref<8x1xf32, #tpu.memory_space<vmem>>, vector<8x1xf32>
    %34 = vector.broadcast %33 : vector<8x1xf32> to vector<8x14xf32>
    %35 = arith.addf %32, %34 : vector<8x14xf32>
    %c0_13 = arith.constant 0 : index
    %c0_14 = arith.constant 0 : index
    %c0_15 = arith.constant 0 : index
    %36 = vector.load %arg8[%c0_13, %c0_14, %c0_15] : memref<1x8x14xf32, #tpu.memory_space<vmem>>, vector<1x8x14xf32>
    %37 = vector.shape_cast %36 : vector<1x8x14xf32> to vector<8x14xf32>
    %38 = vector.shape_cast %35 : vector<8x14xf32> to vector<1x8x14xf32>
    tpu.vector_store %arg8[%c0_13, %c0_14, %c0_15], %38 {strides = array<i32>} : memref<1x8x14xf32, #tpu.memory_space<vmem>>, vector<1x8x14xf32>,
    return
  }
  func.func @transform_0(%arg0: i32, %arg1: i32) -> i32 {
    %c0_i32 = arith.constant 0 : i32
    %c0_i32_0 = arith.constant 0 : i32
    return %c0_i32 : i32
  }
  func.func @transform_1(%arg0: i32, %arg1: i32) -> (i32, i32, i32) {
    %c0_i32 = arith.constant 0 : i32
    %c0_i32_0 = arith.constant 0 : i32
    %c0_i32_1 = arith.constant 0 : i32
    return %arg0, %c0_i32, %c0_i32_0 : i32, i32, i32
  }
  func.func @transform_2(%arg0: i32, %arg1: i32) -> (i32, i32) {
    %c0_i32 = arith.constant 0 : i32
    %c0_i32_0 = arith.constant 0 : i32
    %c0_i32_1 = arith.constant 0 : i32
    return %c0_i32, %c0_i32_0 : i32, i32
  }
  func.func @transform_3(%arg0: i32, %arg1: i32) -> (i32, i32) {
    %c0_i32 = arith.constant 0 : i32
    %c0_i32_0 = arith.constant 0 : i32
    %c0_i32_1 = arith.constant 0 : i32
    return %c0_i32, %c0_i32_0 : i32, i32
  }
  func.func @transform_4(%arg0: i32, %arg1: i32) -> (i32, i32) {
    %c0_i32 = arith.constant 0 : i32
    %c0_i32_0 = arith.constant 0 : i32
    %c0_i32_1 = arith.constant 0 : i32
    return %c0_i32, %c0_i32_0 : i32, i32
  }
  func.func @transform_5(%arg0: i32, %arg1: i32) -> (i32, i32) {
    %c0_i32 = arith.constant 0 : i32
    %c0_i32_0 = arith.constant 0 : i32
    %c0_i32_1 = arith.constant 0 : i32
    return %c0_i32, %c0_i32_0 : i32, i32
  }
  func.func @transform_6(%arg0: i32, %arg1: i32) -> (i32, i32, i32) {
    %c0_i32 = arith.constant 0 : i32
    %c0_i32_0 = arith.constant 0 : i32
    return %arg0, %c0_i32, %arg1 : i32, i32, i32
  }
}

</mosaic_0001>

<bundles_post_ra>
// kernel: tpu_custom_call.1
= control target key start
LH: loop header
LB: loop body
LE: loop exit
PB: predicated region body
PF: predicated region fallthrough
CT: control target
= control target key end

     0   :  { %11 = vsyncpa [#allocation4], 0  ;;  %s870_s0 = inlined_call_operand.vmem [shape: f32[3], index: 0, kind: input, shape index: {}]   ;;  %s871_s1 = inlined_call_operand.vmem [shape: f32[2,8,16], index: 1, kind: input, shape index: {}]   ;;  %s872_s2 = inlined_call_operand.vmem [shape: bf16[8,24], index: 2, kind: input, shape index: {}]   ;;  %s873_s3 = inlined_call_operand.vmem [shape: f32[8,1], index: 3, kind: input, shape index: {}]   ;;  %s874_s4 = inlined_call_operand.vmem [shape: f32[8,1], index: 4, kind: input, shape index: {}]   ;;  %s875_s5 = inlined_call_operand.vmem [shape: f32[8,1], index: 5, kind: input, shape index: {}]   ;;  %s876_s6 = inlined_call_operand.hbm [shape: f32[2,8,14], index: 6, kind: output, shape index: {}]  }
   0x1   :  { %12 = vsyncpa [#allocation3], 0 }
   0x2   :  { %14 = vsyncpa [#allocation3 + $0x1], 0  ;;  %s725_s21 = smov 0   ;;  %s727_s22 = smov 0  }
   0x3   :  { %s729_s23 = smov 0   ;;  %s731_s24 = smov 0  }
   0x4   :  { %s733_s25 = smov 0   ;;  %s735_s26 = smov 0  }
   0x5 LB: > { %s485_s27 = sadd.s32 4294967295, %s681_s26   ;;  %s486_s28 = sadd.s32 4294967294, %s681_s26   ;;  %s681_s26 = sphi %s735_s26, %s20_s26   ;;  %s677_s25 = sphi %s733_s25, %s885_s25   ;;  %s673_s24 = sphi %s731_s24, %s884_s24   ;;  %s669_s23 = sphi %s729_s23, %s883_s23   ;;  %s665_s22 = sphi %s727_s22, %s882_s22   ;;  %s661_s21 = sphi %s725_s21, %s881_s21  }
   0x6   : > { %s32_s29 = sadd.s32 1, %s677_s25  ;;  %s172_s30 = sadd.s32 1, %s669_s23 }
   0x7   : > { %p34_p0 = scmp.ge.s32.totalorder %s32_s29, 2  ;;  %p182_p1 = scmp.ne.s32.totalorder %s669_s23, %s665_s22 }
   0x8   : > { %p183_p2 = scmp.eq.s32.totalorder %s485_s27, 1  ;;  %p188_p3 = scmp.ne.s32.totalorder %s665_s22, %s661_s21 }
   0x9   : > { %s887_s29 = smov (%p34_p0, %s32_s29), 0  ;;  %p189_p5 = scmp.eq.s32.totalorder %s486_s28, 1 }
   0xa   : > { %p765_p4 = por %p183_p2, %p182_p1  ;;  %s167_s8 = ssub.s32 %s677_s25, %s887_s29 }
   0xb   : > { %p487_p6 = scmp.ge.s32.totalorder %s681_s26, 1  ;;  %p170_p7 = scmp.eq.s32.totalorder %s167_s8, 0 }
   0xc   : > { %p772_p8 = por %p189_p5, %p188_p3  ;;  %p196_p9 = scmp.lt.s32.totalorder %s681_s26, 3 }
   0xd   : > { %s778_s10 = scalar_select %p170_p7, %s669_s23, %s172_s30  }
   0xe   : > { %p780_p10 = pnand %p487_p6, %p196_p9  ;;  %p784_p11 = scmp.eq.s32.totalorder %s485_s27, 0 }
   0xf   : > { %s209_s15 = sshll.u32 %s870_s0, 4  ;;  %s210_s15 = int_to_ptr.vmem [resolvable:$true] %s209_s15 }
  0x10   : > { %p517_p12 = pneg %p780_p10  ;;  %s584_s16 = scalar_lea.vmem %s210_s15, 16 }
  0x11   : > { %p585_p0 = scmp.ne.s32.totalorder %s210_s15, %s584_s16  ;;  %p592_p5 = scmp.lt.s32.totalorder %s210_s15, %s210_s15 }
  0x12   : > { %p518_p13 = pnand %p784_p11, %p517_p12  ;;  %p593_p6 = scmp.lt.s32.totalorder %s584_s16, %s584_s16 }
  0x14   : > { %p586_p1 = pneg %p518_p13  ;;  %p594_p7 = por %p593_p6, %p592_p5 }
  0x16   : > { %p587_p2 = pnand %p586_p1, %p585_p0 }
  0x18   : > { %p588_p3 = pneg %p587_p2 }
  0x1a   : > { %p595_p9 = pnand %p594_p7, %p588_p3 }
  0x1c   : > { %598 = shalt.err (!%p595_p9)
}
  0x1d   : > { %s683_s17 = smov [#allocation2]   ;;  %241 = sbr.rel (%p780_p10) target bundleno = 413 (0x19d), region = 44 }
  0x1e   : > { %520 = dma.vmem_to_smem (!%p518_p13), %s210_s15, 16, %s683_s17, [#allocation4]  }
  0x24   : > { %652 = dma.done.wait (%p784_p11), [#allocation4], 16  }
  0x25   : > { %654 = vsyncadd (%p784_p11), [#allocation4], 4294967280 }
  0x26   : > { %247 = sfence }
  0x27   : > { %p271_p12 = scmp.lt.s32.totalorder %s673_s24, 1  ;;  %s277_s18 = sld [smem:[#allocation2]]  ;;  %v684_v2 = vmov 0.0   ;;  %vm685_vm0 = vmmov 0   ;;  %v362_v8 = vld [vmem:[%s873_s3] sm:$0xff]  ;;  %vm345_vm1 = vcmask 130048   ;;  %v375_v28 = vlaneseq }
  0x28   : > { %s494_s19 = sld [smem:[#allocation2 + $0x1]]  ;;  %503 = vmatprep.subr.bf16.mxu0 %v684_v2  ;;  %507 = vmatprep.mubr.msk.bf16.mxu0 %vm685_vm0, %v684_v2  ;;  %v686_v10 = vmov 0   ;;  %v369_v14 = vld [vmem:[%s874_s4] sm:$0xff]  ;;  %s687_s15 = smov 127   ;;  %vm292_vm2 = vcmask 1043456   ;;  %vm298_vm3 = vcmask 195584  }
  0x29   : > { %s272_s20 = scalar_select %p271_p12, %s673_s24, 1  ;;  %582 = vset.pattern.permute.xlu1 %v686_v10  ;;  %583 = vset.pattern.permute.xlu0 %v686_v10  ;;  %v381_v20 = vld [vmem:[%s875_s5] sm:$0xff]  ;;  %v376_v31 = vshrl.u32 %v375_v28, 7  ;;  %vm388_vm4 = vcmask 113664  }
  0x2a   : > { %365 = vperm.xlu1 %582, %v362_v8   ;;  %s688_s16 = smov 126   ;;  %v297_v25 = vld [vmem:[%s872_s2] sm:$0xf]  ;;  %s497_s30 = sshll.u32 %s673_s24, 7 }
  0x2b   : > { %s493_s27 = sshll.u32 %s272_s20, 3  ;;  %v377_v33 = vsub.s32 0, %v376_v31  ;;  %s823_s14 = scalar_lea.hbm %s876_s6, %s497_s30 }
  0x2c   : > { %s274_s8 = scalar_lea.vmem %s871_s1, %s493_s27  ;;  %s268_s27 = sand.u32 1, %s665_s22  }
  0x2d   : > { %v276_v0 = vld [vmem:[%s274_s8] sm:$0xff]  ;;  %v280_v1 = vstv %s277_s18  ;;  %s492_s28 = sshll.u32 %s268_s27, 3  ;;  %s689_s24 = smov [#allocation5]  }
  0x2e   : > { %v279_v3 = vmax.f32 %v276_v0, 0.0  ;;  %v282_v4 = vstv %s494_s19  ;;  %372 = vperm.xlu1 %582, %v369_v14   ;;  %s270_s8 = scalar_lea.vmem [#allocation5], %s492_s28  ;;  %s603_s17 = sshll.u32 %s689_s24, 4  ;;  %s604_s17 = int_to_ptr.vmem [resolvable:$false] %s603_s17 }
  0x2f   : > { %s405_s11 = sshll.u32 %s270_s8, 4  ;;  %s605_s18 = scalar_lea.vmem %s604_s17, 256  ;;  %s825_s11 = int_to_ptr.vmem [resolvable:$true] %s405_s11 }
  0x30   : > { %v281_v5 = vmin.f32 %v280_v1, %v279_v3  ;;  %p606_p0 = scmp.lt.s32.totalorder %s825_s11, %s604_s17 }
  0x32   : > { %v283_v6 = vmul.f32 %v282_v4, %v281_v5 }
  0x34   : > { %v284_v7 = vfloor.f32 %v283_v6 }
  0x36   : > { %v285_v9 = vpack.c.bf16 %v284_v7, %v284_v7  ;;  %v346_v11 = vsel %vm345_vm1, %v284_v7, 0.0 }
  0x37   : > { %v347_v12 = vrot.slane %v346_v11, 4 }
  0x38   : > { %v287_v13 = vrot.slane %v285_v9, 4 }
  0x39   : > { %v348_v15 = vadd.f32 %v347_v12, %v346_v11 }
  0x3a   : > { %288 = vrot.lane.b32.xlu0 %v287_v13, %s687_s15 }
  0x3b   : > { %v349_v16 = vrot.slane %v348_v15, 2 }
  0x3d   : > { %v350_v17 = vadd.f32 %v349_v16, %v348_v15 }
  0x3e   : > { %290 = vrot.lane.b32.xlu0 %v285_v9, %s688_s16 }
  0x3f   : > { %v351_v18 = vrot.slane %v350_v17, 1 }
  0x41   : > { %v352_v19 = vadd.f32 %v351_v18, %v350_v17 }
  0x43   : > { %354 = vrot.lane.b32.xlu0 %v352_v19, %s687_s15  ;;  %358 = vrot.lane.b32.xlu1 %v352_v19, %s688_s16  ;;  %s391_s15 = scalar_lea.sflag [#allocation3], %s268_s27  ;;  %s599_s16 = scalar_lea.vmem %s825_s11, 128 }
  0x44   : > { %p600_p10 = scmp.ne.s32.totalorder %s825_s11, %s599_s16  ;;  %p607_p1 = scmp.lt.s32.totalorder %s605_s18, %s599_s16 }
  0x46   : > { %p601_p11 = pnand %p600_p10, %p765_p4  ;;  %p608_p2 = por %p607_p1, %p606_p0 }
  0x47   : > { %384 = vperm.xlu0 %583, %v381_v20  }
  0x48   : > { %p602_p13 = pneg %p601_p11 }
  0x4a   : > { %p609_p3 = pnand %p608_p2, %p602_p13 }
  0xa9   : > { %v366_v26 = vpop.permute.xlu1 %365 }
  0xac   : > { %v289_v21 = vpop.permute.xlu0 %288 }
  0xad   : > { %v295_v22 = vsel %vm292_vm2, %v285_v9, %v289_v21  ;;  %v373_v27 = vpop.permute.xlu1 %372 }
  0xae   : > { %504 = vmatpush3.bf16.msra.mxu0 %v295_v22 }
  0xaf   : > { %505 = vmatprep.subr.bf16.mxu0 %v684_v2 }
  0xb0   : > { %v291_v23 = vpop.permute.xlu0 %290 }
  0xb1   : > { %v303_v24 = vsel %vm292_vm2, %v291_v23, 0 }
  0xb2   : > { %506 = vmatpush3.bf16.msra.mxu0 %v303_v24 }
  0xb5   : > { %508 = vmatmul.mubr.msk.bf16.vlgmr.msra.gmra.mrb[0].mxu0 %vm298_vm3, %v297_v25  ;;  %v355_v29 = vpop.permute.xlu0 %354  ;;  %v359_v32 = vpop.permute.xlu1 %358 }
  0xb6   : > { %v357_v30 = vadd.f32 %v355_v29, %v352_v19 }
  0xb8   : > { %v361_v34 = vadd.f32 %v359_v32, %v357_v30 }
  0xba   : > { %v378_v35 = vrot.slane %v361_v34, %v377_v33 }
  0xbc   : > { %v379_v39 = vmul.f32 %v378_v35, %v373_v27 }
  0xc6   : > { %v385_v41 = vpop.permute.xlu0 %384 }
 0x188   : > { %v339_v36 = vpop.f32.mrb[0].mxu0 }
 0x189   : > { %v368_v37 = vmul.f32 %v366_v26, %v339_v36  ;;  %v509_v38 = vpop.f32.mrb[1].mxu0 }
 0x18a   : > { %v342_v40 = vpop.f32.mrb[2].mxu0 }
 0x18b   : > { %v510_v42 = vpop.f32.mrb[3].mxu0  ;;  %v380_v43 = vadd.f32 %v379_v39, %v368_v37 }
 0x18d   : > { %v387_v44 = vadd.f32 %v385_v41, %v380_v43 }
 0x18f   : > { %389 = vst.msk [vmem:[%s270_s8] sm:$0xff] %vm388_vm4, %v387_v44 }
 0x190   : > { %612 = shalt.err (!%p609_p3)
}
 0x191   : > { %s613_s19 = scalar_lea.hbm %s823_s14, 128  ;;  %s617_s28 = scalar_lea.hbm %s876_s6, 256 }
 0x192   : > { %p614_p5 = scmp.ne.s32.totalorder %s823_s14, %s613_s19  ;;  %p618_p9 = scmp.lt.u32.totalorder %s823_s14, %s876_s6 }
 0x193   : > { %p619_p12 = scmp.lt.u32.totalorder %s617_s28, %s613_s19  ;;  %p621_p11 = scmp.lt.u32.totalorder %s613_s19, %s823_s14 }
 0x194   : > { %p615_p6 = pnand %p614_p5, %p765_p4 }
 0x195   : > { %p620_p10 = por %p619_p12, %p618_p9 }
 0x196   : > { %p616_p7 = pneg %p615_p6 }
 0x197   : > { %p622_p13 = por %p621_p11, %p620_p10 }
 0x199   : > { %p623_p0 = pnand %p622_p13, %p616_p7 }
 0x19b   : > { %626 = shalt.err (!%p623_p0)
}
 0x19c   : > { %515 = dma.vmem_to_hbm [thread:$0]  (%p765_p4), %s825_s11, 128, %s823_s14, %s391_s15  }
 0x19d PF: > { %p527_p1 = scmp.ge.s32.totalorder %s681_s26, 2  ;;  %s417_s12 = sand.u32 1, %s661_s21  }
 0x19e   : > { %s418_s13 = scalar_lea.sflag [#allocation3], %s417_s12 }
 0x19f   : > { %p522_p2 = pnand %p527_p1, %p772_p8 }
 0x1a1   : > { %656 = dma.done.wait (!%p522_p2), %s418_s13, 128  }
 0x1a2   : > { %658 = vsyncadd (!%p522_p2), %s418_s13, 4294967168  ;;  %s20_s26 = sadd.s32 1, %s681_s26   ;;  %s881_s21 = smov %s665_s22 }
 0x1a3   : > { %p17_p3 = scmp.ge.s32.totalorder %s20_s26, 4   ;;  %s882_s22 = smov %s669_s23 }
 0x1a4   : > { %s883_s23 = smov %s778_s10  ;;  %s884_s24 = smov %s677_s25 }
 0x1a5   : > { %s885_s25 = smov %s887_s29  ;;  %19 = sbr.rel (!%p17_p3) target bundleno = 5 (0x5), region = 84 }
 0x1ac   :  { %423 = vsyncpa [#allocation3], 1 }
 0x1ad   :  { %425 = vsyncpa [#allocation3 + $0x1], 1 }
 0x1ae   :  { %426 = vsyncpa [#allocation4], 1 }
 0x1af   :  { %428 = vsyncpa [#allocation4 + $0x1], 1 }

</bundles_post_ra>
